<compile_context>
chip_gen: v6e
topology: v6e:2x2x1
jax: 0.10.0
libtpu: 0.0.40
codegen_flags: <defaults>
</compile_context>

<pallas_src>
import jax
import jax.numpy as jnp
from jax.experimental import pallas as pl
from jax.experimental.pallas import tpu as pltpu

IN_FEATURES = 40
OUT_FEATURES = 30


def _round_up(n: int, m: int) -> int:
    return ((n + m - 1) // m) * m


def _nest_mlp_kernel(x_ref, w_ref, b_ref, o_ref):
    # x_ref: (40, TB)  w_ref: (30, 40)  b_ref: (30, 1)  o_ref: (30, TB)
    acc = jnp.dot(w_ref[...], x_ref[...], preferred_element_type=jnp.float32)
    acc = acc + b_ref[...]                      # broadcast bias along lanes
    o_ref[...] = jnp.maximum(acc, 0.0).astype(o_ref.dtype)


def nest_mlp_forward(x, w, b, *, max_tile=4096):
    """NestMLP forward: ReLU(x @ W^T + b).

    x: (B, 40) f32, w: (30, 40) f32 (PyTorch nn.Linear layout), b: (30,) f32
    -> (B, 30) f32.
    """
    B = x.shape[0]
    dtype = x.dtype

    # Batch tile: multiple of 128 (lane axis), capped so the double-buffered
    # working set stays small (TB=4096 f32 -> ~2.3 MB total, fine for
    # v5e/v6e defaults and well under v7x's 64 MiB VMEM).
    TB = min(max_tile, _round_up(max(B, 1), 128))
    B_pad = _round_up(B, TB)
    grid = (pl.cdiv(B_pad, TB),)

    # Wrapper-side layout plumbing: pad ragged batch, put batch on lanes.
    if B_pad != B:
        x = jnp.pad(x, ((0, B_pad - B), (0, 0)))
    x_t = x.T                                   # (40, B_pad)
    b2 = b.reshape(OUT_FEATURES, 1)             # (30, 1)

    # VMEM budget: 2x double-buffered (x tile + out tile) + resident params,
    # plus headroom; capped to stay v7x-safe.
    tile_bytes = (IN_FEATURES + OUT_FEATURES) * TB * dtype.itemsize
    param_bytes = (IN_FEATURES * OUT_FEATURES + OUT_FEATURES) * dtype.itemsize
    vmem_limit = min(max(2 * tile_bytes + 2 * param_bytes + (4 << 20), 8 << 20),
                     64 << 20)

    cost = pl.CostEstimate(
        flops=2 * B_pad * IN_FEATURES * OUT_FEATURES,
        bytes_accessed=B_pad * (IN_FEATURES + OUT_FEATURES) * dtype.itemsize
        + param_bytes,
        transcendentals=0,
    )

    out_t = pl.pallas_call(
        _nest_mlp_kernel,
        out_shape=jax.ShapeDtypeStruct((OUT_FEATURES, B_pad), dtype),
        grid=grid,
        in_specs=[
            # x^T tile: (40, TB), new batch tile each grid step.
            pl.BlockSpec((IN_FEATURES, TB), lambda i: (0, i)),
            # Weight / bias: resident in VMEM across all grid steps.
            pl.BlockSpec((OUT_FEATURES, IN_FEATURES), lambda i: (0, 0)),
            pl.BlockSpec((OUT_FEATURES, 1), lambda i: (0, 0)),
        ],
        out_specs=pl.BlockSpec((OUT_FEATURES, TB), lambda i: (0, i)),
        compiler_params=pltpu.CompilerParams(
            dimension_semantics=("parallel",),
            vmem_limit_bytes=vmem_limit,
        ),
        cost_estimate=cost,
    )(x_t, w, b2)

    return out_t[:, :B].T                        # (B, 30)


def init_params(key):
    """Deterministic init mimicking torch.nn.Linear default (uniform +-1/sqrt(fan_in))."""
    k_w, k_b = jax.random.split(key)
    bound = 1.0 / jnp.sqrt(jnp.float32(IN_FEATURES))
    # PyTorch weight layout: (out_features, in_features) = (30, 40).
    w = jax.random.uniform(
        k_w, (OUT_FEATURES, IN_FEATURES), jnp.float32, -bound, bound
    )
    b = jax.random.uniform(k_b, (OUT_FEATURES,), jnp.float32, -bound, bound)
    return w, b


if __name__ == "__main__":
    key = jax.random.PRNGKey(0)
    k_x, k_p, k_x2 = jax.random.split(key, 3)
    w, b = init_params(k_p)

    # Small demo batch (matches the module's trivial usage).
    B = 2
    x = jax.random.normal(k_x, (B, IN_FEATURES), jnp.float32)
    out = jax.block_until_ready(nest_mlp_forward(x, w, b))
    ref = jnp.maximum(
        jnp.dot(x, w.T, precision=jax.lax.Precision.HIGHEST) + b, 0.0
    )
    assert out.shape == (B, OUT_FEATURES)
    assert jnp.allclose(out, ref, atol=1e-4, rtol=1e-4)

    # Exercise the multi-tile grid + ragged-batch padding path.
    B2 = 260
    x2 = jax.random.normal(k_x2, (B2, IN_FEATURES), jnp.float32)
    out2 = jax.block_until_ready(nest_mlp_forward(x2, w, b, max_tile=128))
    ref2 = jnp.maximum(
        jnp.dot(x2, w.T, precision=jax.lax.Precision.HIGHEST) + b, 0.0
    )
    assert out2.shape == (B2, OUT_FEATURES)
    assert jnp.allclose(out2, ref2, atol=1e-4, rtol=1e-4)

    print("KERNEL_OK")
</pallas_src>

<mosaic_0001>
module attributes {stable_mosaic.version = 11 : i64} {
  func.func @_nest_mlp_kernel(%arg0: i32, %arg1: memref<40x128xf32, #tpu.memory_space<vmem>>, %arg2: memref<30x40xf32, #tpu.memory_space<vmem>>, %arg3: memref<30x1xf32, #tpu.memory_space<vmem>>, %arg4: memref<30x128xf32, #tpu.memory_space<vmem>>) attributes {dimension_semantics = [#tpu.dimension_semantics<parallel>], iteration_bounds = array<i64: 1>, scalar_prefetch = 0 : i64, scratch_operands = 0 : i64, tpu.core_type = #tpu.core_type<tc>, window_params = [{transform_indices = @transform_0, window_bounds = array<i64: 40, 128>}, {pipeline_mode = #tpu.pipeline_mode<synchronous>, transform_indices = @transform_1, window_bounds = array<i64: 30, 40>}, {pipeline_mode = #tpu.pipeline_mode<synchronous>, transform_indices = @transform_2, window_bounds = array<i64: 30, 1>}, {transform_indices = @transform_3, window_bounds = array<i64: 30, 128>}]} {
    %c0 = arith.constant 0 : index
    %c0_0 = arith.constant 0 : index
    %0 = vector.load %arg2[%c0, %c0_0] : memref<30x40xf32, #tpu.memory_space<vmem>>, vector<30x40xf32>
    %c0_1 = arith.constant 0 : index
    %c0_2 = arith.constant 0 : index
    %1 = vector.load %arg1[%c0_1, %c0_2] : memref<40x128xf32, #tpu.memory_space<vmem>>, vector<40x128xf32>
    %cst = arith.constant dense<0.000000e+00> : vector<30x128xf32>
    %2 = tpu.matmul %0, %1, %cst {dimension_numbers = #tpu.dot_dimension_numbers<[1], [0], [0], [1], [0, 0, 1, 1], [], []>} : vector<30x40xf32>, vector<40x128xf32>, vector<30x128xf32> -> vector<30x128xf32>
    %c0_3 = arith.constant 0 : index
    %c0_4 = arith.constant 0 : index
    %3 = vector.load %arg3[%c0_3, %c0_4] : memref<30x1xf32, #tpu.memory_space<vmem>>, vector<30x1xf32>
    %4 = vector.broadcast %3 : vector<30x1xf32> to vector<30x128xf32>
    %5 = arith.addf %2, %4 : vector<30x128xf32>
    %cst_5 = arith.constant 0.000000e+00 : f32
    %6 = vector.broadcast %cst_5 : f32 to vector<30x128xf32>
    %7 = arith.maximumf %5, %6 : vector<30x128xf32>
    %c0_6 = arith.constant 0 : index
    %c0_7 = arith.constant 0 : index
    %8 = vector.load %arg4[%c0_6, %c0_7] : memref<30x128xf32, #tpu.memory_space<vmem>>, vector<30x128xf32>
    tpu.vector_store %arg4[%c0_6, %c0_7], %7 {strides = array<i32>} : memref<30x128xf32, #tpu.memory_space<vmem>>, vector<30x128xf32>,
    return
  }
  func.func @transform_0(%arg0: i32) -> (i32, i32) {
    %c0_i32 = arith.constant 0 : i32
    %c0_i32_0 = arith.constant 0 : i32
    return %c0_i32, %arg0 : i32, i32
  }
  func.func @transform_1(%arg0: i32) -> (i32, i32) {
    %c0_i32 = arith.constant 0 : i32
    %c0_i32_0 = arith.constant 0 : i32
    %c0_i32_1 = arith.constant 0 : i32
    return %c0_i32, %c0_i32_0 : i32, i32
  }
  func.func @transform_2(%arg0: i32) -> (i32, i32) {
    %c0_i32 = arith.constant 0 : i32
    %c0_i32_0 = arith.constant 0 : i32
    %c0_i32_1 = arith.constant 0 : i32
    return %c0_i32, %c0_i32_0 : i32, i32
  }
  func.func @transform_3(%arg0: i32) -> (i32, i32) {
    %c0_i32 = arith.constant 0 : i32
    %c0_i32_0 = arith.constant 0 : i32
    return %c0_i32, %arg0 : i32, i32
  }
}

</mosaic_0001>

<bundles_post_ra>
// kernel: tpu_custom_call.1
= control target key start
LH: loop header
LB: loop body
LE: loop exit
PB: predicated region body
PF: predicated region fallthrough
CT: control target
= control target key end

     0   :  { %8 = vsyncpa [#allocation3], 0  ;;  %s336_s0 = inlined_call_operand.hbm [shape: f32[40,128], index: 0, kind: input, shape index: {}]   ;;  %s337_s1 = inlined_call_operand.vmem [shape: f32[30,40], index: 1, kind: input, shape index: {}]   ;;  %s338_s2 = inlined_call_operand.vmem [shape: f32[30,1], index: 2, kind: input, shape index: {}]   ;;  %s339_s3 = inlined_call_operand.hbm [shape: f32[30,128], index: 3, kind: output, shape index: {}]  }
   0x1   :  { %9 = vsyncpa [#allocation4], 0  ;;  %s275_s12 = smov [#allocation2]  }
   0x2   :  { %s15_s13 = sshll.u32 %s275_s12, 4  ;;  %s16_s13 = int_to_ptr.vmem [resolvable:$true] %s15_s13 }
   0x3   :  { %s239_s14 = scalar_lea.vmem %s16_s13, 640  ;;  %p244_p1 = scmp.lt.s32.totalorder %s16_s13, %s16_s13 }
   0x4   :  { %p240_p0 = scmp.ne.s32.totalorder %s16_s13, %s239_s14  ;;  %p245_p2 = scmp.lt.s32.totalorder %s239_s14, %s239_s14 }
   0x6   :  { %p246_p3 = por %p245_p2, %p244_p1 }
   0x8   :  { %p247_p4 = pnand %p246_p3, %p240_p0 }
   0xa   :  { %250 = shalt.err (!%p247_p4)
}
   0xb   :  { %s276_s15 = smov 128   ;;  %s277_s16 = smov 8  }
   0xc   :  { %21 = dma.hbm_to_vmem [thread:$0]  %s336_s0, 640, %s16_s13, [#allocation3], %s276_s15, %s276_s15, %s277_s16  }
   0xd   :  { %271 = dma.done.wait [#allocation3], 640  }
   0xe   :  { %272 = vsyncadd [#allocation3], 4294966656  ;;  %v278_v0 = vmov 0   ;;  %v37_v1 = vld [vmem:[#allocation2 + $0x20] sm:$0xff]  ;;  %v36_v2 = vld [vmem:[#allocation2 + $0x18] sm:$0xff]  ;;  %vm62_vm0 = vcmask 326656  }
   0xf   :  { %230 = vset.pattern.permute.xlu1 %v278_v0  ;;  %229 = vset.pattern.permute.xlu0 %v278_v0  ;;  %v35_v3 = vld [vmem:[#allocation2 + $0x10] sm:$0xff]  ;;  %v34_v4 = vld [vmem:[#allocation2 + $0x8] sm:$0xff]  ;;  %v33_v5 = vld [vmem:[#allocation2] sm:$0xff]  ;;  %s279_s6 = smov [#allocation5]  }
  0x10   :  { %198 = vmatprep.subr.mxu0 %v37_v1  ;;  %214 = vmatprep.subr.mxu1 %v37_v1  ;;  %v29_v6 = vld [vmem:[%s337_s1] sm:$0xff]  ;;  %v31_v7 = vld [vmem:[%s337_s1 + $0x10] sm:$0xff]  ;;  %v30_v8 = vld [vmem:[%s337_s1 + $0x8] sm:$0xff]  ;;  %s173_s7 = sshll.u32 %s279_s6, 4  ;;  %s174_s7 = int_to_ptr.vmem [resolvable:$true] %s173_s7 }
  0x11   :  { %199 = vmatpush3.msra.mxu0 %v37_v1  ;;  %219 = vmatpush3.msra.mxu1 %v37_v1  ;;  %v32_v9 = vld [vmem:[%s337_s1 + $0x18] sm:$0x3f]  ;;  %v40_v10 = vld [vmem:[%s338_s2 + $0x10] sm:$0xff]  ;;  %v38_v11 = vld [vmem:[%s338_s2] sm:$0xff]  ;;  %p256_p6 = scmp.lt.s32.totalorder %s174_s7, %s174_s7 }
  0x12   :  { %200 = vmatprep.subr.mxu0 %v36_v2  ;;  %215 = vmatprep.subr.mxu1 %v36_v2  ;;  %v41_v12 = vld [vmem:[%s338_s2 + $0x18] sm:$0x3f]  ;;  %v39_v13 = vld [vmem:[%s338_s2 + $0x8] sm:$0xff]  ;;  %s251_s2 = scalar_lea.vmem %s174_s7, 512 }
  0x13   :  { %201 = vmatpush3.msra.mxu0 %v36_v2  ;;  %220 = vmatpush3.msra.mxu1 %v36_v2  ;;  %p252_p5 = scmp.ne.s32.totalorder %s174_s7, %s251_s2  ;;  %p257_p7 = scmp.lt.s32.totalorder %s251_s2, %s251_s2 }
  0x14   :  { %202 = vmatprep.subr.mxu0 %v35_v3  ;;  %216 = vmatprep.subr.mxu1 %v35_v3 }
  0x15   :  { %203 = vmatpush3.msra.mxu0 %v35_v3  ;;  %221 = vmatpush3.msra.mxu1 %v35_v3  ;;  %p258_p8 = por %p257_p7, %p256_p6 }
  0x16   :  { %204 = vmatprep.subr.mxu0 %v34_v4  ;;  %217 = vmatprep.subr.mxu1 %v34_v4 }
  0x17   :  { %205 = vmatpush3.msra.mxu0 %v34_v4  ;;  %222 = vmatpush3.msra.mxu1 %v34_v4  ;;  %p259_p9 = pnand %p258_p8, %p252_p5 }
  0x18   :  { %206 = vmatprep.subr.mxu0 %v33_v5  ;;  %218 = vmatprep.subr.mxu1 %v33_v5 }
  0x19   :  { %207 = vmatpush3.msra.mxu0 %v33_v5  ;;  %223 = vmatpush3.msra.mxu1 %v33_v5 }
  0x1a   :  { %208 = vmatprep.mubr.msk.f32.mxu0 %vm62_vm0, %v29_v6  ;;  %211 = vmatprep.mubr.msk.f32.mxu1 %vm62_vm0, %v31_v7 }
  0x1b   :  { %209 = vmatmul.mubr.msk.f32.vlgmr.msra.gmra.mxu0 %vm62_vm0, %v30_v8  ;;  %212 = vmatmul.mubr.msk.f32.vlgmr.msra.gmra.mxu1 %vm62_vm0, %v32_v9 }
  0x1c   :  { %54 = vperm.xlu1 %230, %v40_v10   ;;  %44 = vperm.xlu0 %229, %v38_v11  }
  0x20   :  { %59 = vperm.xlu1 %230, %v41_v12   ;;  %49 = vperm.xlu0 %229, %v39_v13  }
  0x97   :  { %v55_v14 = vpop.permute.xlu1 %54  ;;  %v45_v15 = vpop.permute.xlu0 %44 }
  0x9b   :  { %v60_v16 = vpop.permute.xlu1 %59  ;;  %v50_v17 = vpop.permute.xlu0 %49 }
  0xdb   :  { %v210_v18 = vpop.f32.mrf.mxu0  ;;  %v213_v19 = vpop.f32.mrf.mxu1 }
  0xdc   :  { %v147_v20 = vadd.f32 %v210_v18, %v50_v17  ;;  %v157_v21 = vadd.f32 %v213_v19, %v60_v16 }
  0xdd   :  { %v141_v22 = vpop.f32.mrf.mxu0  ;;  %v151_v23 = vpop.f32.mrf.mxu1 }
  0xde   :  { %v161_v24 = vmax.f32 %v147_v20, 0.0  ;;  %v163_v25 = vmax.f32 %v157_v21, 0.0  ;;  %v142_v26 = vadd.f32 %v141_v22, %v45_v15  ;;  %v152_v27 = vadd.f32 %v151_v23, %v55_v14 }
  0xe0   :  { %165 = vst [vmem:[#allocation5 + $0x8] sm:$0xff] %v161_v24  ;;  %167 = vst [vmem:[#allocation5 + $0x18] sm:$0x3f] %v163_v25  ;;  %v160_v28 = vmax.f32 %v142_v26, 0.0  ;;  %v162_v29 = vmax.f32 %v152_v27, 0.0 }
  0xe2   :  { %164 = vst [vmem:[#allocation5] sm:$0xff] %v160_v28  ;;  %166 = vst [vmem:[#allocation5 + $0x10] sm:$0xff] %v162_v29 }
  0xe3   :  { %262 = shalt.err (!%p259_p9)
}
  0xe4   :  { %179 = dma.vmem_to_hbm [thread:$0]  %s174_s7, 512, %s339_s3, [#allocation4], %s276_s15, %s276_s15, %s277_s16  }
  0xe5   :  { %273 = dma.done.wait [#allocation4], 512  }
  0xe6   :  { %274 = vsyncadd [#allocation4], 4294966784 }
  0xe7   :  { %183 = vsyncpa [#allocation3], 1 }
  0xe8   :  { %184 = vsyncpa [#allocation4], 1 }

</bundles_post_ra>
